<compile_context>
chip_gen: v6e
topology: v6e:2x2x1
jax: 0.10.0
libtpu: 0.0.40
codegen_flags: <defaults>
</compile_context>

<pallas_src>
import jax
import jax.numpy as jnp
from jax.experimental import pallas as pl
from jax.experimental.pallas import tpu as pltpu

EPS = 1e-5


def _stats_kernel(x_ref, sum_ref, sumsq_ref):
    """Accumulate per-lane sum and sum-of-squares across row tiles."""
    @pl.when(pl.program_id(0) == 0)
    def _():
        sum_ref[...] = jnp.zeros_like(sum_ref)
        sumsq_ref[...] = jnp.zeros_like(sumsq_ref)

    x = x_ref[...].astype(jnp.float32)
    sum_ref[...] += jnp.sum(x, axis=0, keepdims=True)
    sumsq_ref[...] += jnp.sum(x * x, axis=0, keepdims=True)


def _norm_kernel(scale_ref, shift_ref, x_ref, o_ref):
    """o = x * scale + shift (per-lane scale/shift, sublane-broadcast)."""
    x = x_ref[...].astype(jnp.float32)
    o_ref[...] = (x * scale_ref[...] + shift_ref[...]).astype(o_ref.dtype)


def _pick_row_tile(rows, lane_width, itemsize, max_block_bytes=1 << 21):
    """Largest row tile that divides `rows`, is a multiple of 8 (or the full
    extent), and keeps a block under ~2 MiB so double-buffered in/out blocks
    stay far below even v5e's 16 MiB scoped-VMEM default (and v7x's 64 MiB
    physical VMEM)."""
    max_rows = max(8, max_block_bytes // (lane_width * itemsize))
    if rows <= max_rows:
        return rows
    if rows % 8 == 0:
        start = min(max_rows, rows)
        start -= start % 8
        for t in range(start, 7, -8):
            if rows % t == 0:
                return t
    # Fallback: single full-extent block (always a legal block shape).
    return rows


def spectrogram_norm(inputs, gamma, beta):
    """Forward of SpectrogramNorm (training-mode BatchNorm2d).

    inputs: (T, N, bands, C, freq). gamma, beta: (bands*C,) float32.
    """
    T, N, bands, C, freq = inputs.shape
    channels = bands * C
    assert gamma.shape == (channels,) and beta.shape == (channels,)

    rows = T * N
    lane = channels * freq
    # Free reshape (no transpose, no copy): merges leading (T, N) and the
    # contiguous (bands, C, freq) tail.
    x2d = inputs.reshape(rows, lane)

    itemsize = max(jnp.dtype(inputs.dtype).itemsize, 4)
    row_tile = _pick_row_tile(rows, lane, itemsize)
    num_tiles = rows // row_tile

    # ---- Pass 1: per-lane sum / sum-of-squares (single traversal) ----
    col_sum, col_sq = pl.pallas_call(
        _stats_kernel,
        out_shape=(jax.ShapeDtypeStruct((1, lane), jnp.float32),
                   jax.ShapeDtypeStruct((1, lane), jnp.float32)),
        grid=(num_tiles,),
        in_specs=[pl.BlockSpec((row_tile, lane), lambda i: (i, 0))],
        out_specs=(pl.BlockSpec((1, lane), lambda i: (0, 0)),
                   pl.BlockSpec((1, lane), lambda i: (0, 0))),
        compiler_params=pltpu.CompilerParams(
            dimension_semantics=("arbitrary",)),
    )(x2d)

    # ---- Tiny per-channel finish: fold BN stats + affine into scale/shift ----
    count = float(rows * freq)
    ch_sum = col_sum.reshape(channels, freq).sum(axis=-1)
    ch_sq = col_sq.reshape(channels, freq).sum(axis=-1)
    mean = ch_sum / count
    var = jnp.maximum(ch_sq / count - mean * mean, 0.0)   # biased (training BN)
    inv_std = jax.lax.rsqrt(var + EPS)
    scale = gamma.astype(jnp.float32) * inv_std
    shift = beta.astype(jnp.float32) - mean * scale
    scale_row = jnp.repeat(scale, freq).reshape(1, lane)
    shift_row = jnp.repeat(shift, freq).reshape(1, lane)

    # ---- Pass 2: lane-dense normalize; row tiles independent ----
    out2d = pl.pallas_call(
        _norm_kernel,
        out_shape=jax.ShapeDtypeStruct((rows, lane), inputs.dtype),
        grid=(num_tiles,),
        in_specs=[pl.BlockSpec((1, lane), lambda i: (0, 0)),        # scale
                  pl.BlockSpec((1, lane), lambda i: (0, 0)),        # shift
                  pl.BlockSpec((row_tile, lane), lambda i: (i, 0))],
        out_specs=pl.BlockSpec((row_tile, lane), lambda i: (i, 0)),
        compiler_params=pltpu.CompilerParams(
            dimension_semantics=("parallel",)),
    )(scale_row, shift_row, x2d)

    # Free reshape back to the module's output layout.
    return out2d.reshape(T, N, bands, C, freq)


def _reference(inputs, gamma, beta):
    """Pure-JAX reference mirroring training-mode BatchNorm2d."""
    T, N, bands, C, freq = inputs.shape
    x = inputs.astype(jnp.float32)
    mean = jnp.mean(x, axis=(0, 1, 4), keepdims=True)
    var = jnp.mean((x - mean) ** 2, axis=(0, 1, 4), keepdims=True)
    g = gamma.reshape(1, 1, bands, C, 1)
    b = beta.reshape(1, 1, bands, C, 1)
    y = (x - mean) * jax.lax.rsqrt(var + EPS) * g + b
    return y.astype(inputs.dtype)


if __name__ == "__main__":
    # Small shapes consistent with the module: T=8, N=2, bands=2, C=4, freq=16
    T, N, bands, C, freq = 8, 2, 2, 4, 16
    channels = bands * C

    key = jax.random.PRNGKey(0)
    k_x, _, _ = jax.random.split(key, 3)
    x = jax.random.normal(k_x, (T, N, bands, C, freq), dtype=jnp.float32)
    x = x * 1.5 + 3.0  # nonzero mean exercises the E[x^2]-mean^2 path

    # Deterministic, non-trivial affine params (BatchNorm2d default is
    # gamma=1, beta=0; perturb to exercise the affine path).
    gamma = 1.0 + 0.1 * jnp.arange(channels, dtype=jnp.float32)
    beta = 0.05 * jnp.arange(channels, dtype=jnp.float32)

    fn = jax.jit(spectrogram_norm)
    out = jax.block_until_ready(fn(x, gamma, beta))

    ref = _reference(x, gamma, beta)
    assert out.shape == (T, N, bands, C, freq)
    assert jnp.allclose(out, ref, atol=1e-4, rtol=1e-4), float(
        jnp.max(jnp.abs(out - ref)))

    print("KERNEL_OK")
</pallas_src>

<mosaic_0001>
module attributes {stable_mosaic.version = 11 : i64} {
  func.func @_stats_kernel(%arg0: i32, %arg1: memref<16x128xf32, #tpu.memory_space<vmem>>, %arg2: memref<1x128xf32, #tpu.memory_space<vmem>>, %arg3: memref<1x128xf32, #tpu.memory_space<vmem>>) attributes {dimension_semantics = [#tpu.dimension_semantics<arbitrary>], iteration_bounds = array<i64: 1>, scalar_prefetch = 0 : i64, scratch_operands = 0 : i64, tpu.core_type = #tpu.core_type<tc>, window_params = [{transform_indices = @transform_0, window_bounds = array<i64: 16, 128>}, {pipeline_mode = #tpu.pipeline_mode<synchronous>, transform_indices = @transform_1, window_bounds = array<i64: 1, 128>}, {pipeline_mode = #tpu.pipeline_mode<synchronous>, transform_indices = @transform_2, window_bounds = array<i64: 1, 128>}]} {
    %c0_i32 = arith.constant 0 : i32
    %0 = arith.cmpi eq, %arg0, %c0_i32 : i32
    %1 = arith.extui %0 : i1 to i32
    %c0_i32_0 = arith.constant 0 : i32
    %2 = arith.cmpi ne, %1, %c0_i32_0 : i32
    scf.if %2 {
      %cst_11 = arith.constant 0.000000e+00 : f32
      %15 = vector.broadcast %cst_11 : f32 to vector<1x128xf32>
      %c0_12 = arith.constant 0 : index
      %c0_13 = arith.constant 0 : index
      %16 = vector.load %arg2[%c0_12, %c0_13] : memref<1x128xf32, #tpu.memory_space<vmem>>, vector<1x128xf32>
      tpu.vector_store %arg2[%c0_12, %c0_13], %15 {strides = array<i32>} : memref<1x128xf32, #tpu.memory_space<vmem>>, vector<1x128xf32>,
      %cst_14 = arith.constant 0.000000e+00 : f32
      %17 = vector.broadcast %cst_14 : f32 to vector<1x128xf32>
      %c0_15 = arith.constant 0 : index
      %c0_16 = arith.constant 0 : index
      %18 = vector.load %arg3[%c0_15, %c0_16] : memref<1x128xf32, #tpu.memory_space<vmem>>, vector<1x128xf32>
      tpu.vector_store %arg3[%c0_15, %c0_16], %17 {strides = array<i32>} : memref<1x128xf32, #tpu.memory_space<vmem>>, vector<1x128xf32>,
    } else {
    }
    %c0 = arith.constant 0 : index
    %c0_1 = arith.constant 0 : index
    %3 = vector.load %arg1[%c0, %c0_1] : memref<16x128xf32, #tpu.memory_space<vmem>>, vector<16x128xf32>
    %c0_2 = arith.constant 0 : index
    %c0_3 = arith.constant 0 : index
    %4 = vector.load %arg2[%c0_2, %c0_3] : memref<1x128xf32, #tpu.memory_space<vmem>>, vector<1x128xf32>
    %cst = arith.constant dense<0.000000e+00> : vector<128xf32>
    %5 = vector.multi_reduction <add>, %3, %cst [0] : vector<16x128xf32> to vector<128xf32>
    %6 = vector.shape_cast %5 : vector<128xf32> to vector<1x128xf32>
    %7 = arith.addf %4, %6 : vector<1x128xf32>
    %c0_4 = arith.constant 0 : index
    %c0_5 = arith.constant 0 : index
    %8 = vector.load %arg2[%c0_4, %c0_5] : memref<1x128xf32, #tpu.memory_space<vmem>>, vector<1x128xf32>
    tpu.vector_store %arg2[%c0_4, %c0_5], %7 {strides = array<i32>} : memref<1x128xf32, #tpu.memory_space<vmem>>, vector<1x128xf32>,
    %c0_6 = arith.constant 0 : index
    %c0_7 = arith.constant 0 : index
    %9 = vector.load %arg3[%c0_6, %c0_7] : memref<1x128xf32, #tpu.memory_space<vmem>>, vector<1x128xf32>
    %10 = arith.mulf %3, %3 : vector<16x128xf32>
    %cst_8 = arith.constant dense<0.000000e+00> : vector<128xf32>
    %11 = vector.multi_reduction <add>, %10, %cst_8 [0] : vector<16x128xf32> to vector<128xf32>
    %12 = vector.shape_cast %11 : vector<128xf32> to vector<1x128xf32>
    %13 = arith.addf %9, %12 : vector<1x128xf32>
    %c0_9 = arith.constant 0 : index
    %c0_10 = arith.constant 0 : index
    %14 = vector.load %arg3[%c0_9, %c0_10] : memref<1x128xf32, #tpu.memory_space<vmem>>, vector<1x128xf32>
    tpu.vector_store %arg3[%c0_9, %c0_10], %13 {strides = array<i32>} : memref<1x128xf32, #tpu.memory_space<vmem>>, vector<1x128xf32>,
    return
  }
  func.func @transform_0(%arg0: i32) -> (i32, i32) {
    %c0_i32 = arith.constant 0 : i32
    %c0_i32_0 = arith.constant 0 : i32
    return %arg0, %c0_i32 : i32, i32
  }
  func.func @transform_1(%arg0: i32) -> (i32, i32) {
    %c0_i32 = arith.constant 0 : i32
    %c0_i32_0 = arith.constant 0 : i32
    %c0_i32_1 = arith.constant 0 : i32
    return %c0_i32, %c0_i32_0 : i32, i32
  }
  func.func @transform_2(%arg0: i32) -> (i32, i32) {
    %c0_i32 = arith.constant 0 : i32
    %c0_i32_0 = arith.constant 0 : i32
    %c0_i32_1 = arith.constant 0 : i32
    return %c0_i32, %c0_i32_0 : i32, i32
  }
}

module attributes {stable_mosaic.version = 11 : i64} {
  func.func @_norm_kernel(%arg0: i32, %arg1: memref<1x128xf32, #tpu.memory_space<vmem>>, %arg2: memref<1x128xf32, #tpu.memory_space<vmem>>, %arg3: memref<16x128xf32, #tpu.memory_space<vmem>>, %arg4: memref<16x128xf32, #tpu.memory_space<vmem>>) attributes {dimension_semantics = [#tpu.dimension_semantics<parallel>], iteration_bounds = array<i64: 1>, scalar_prefetch = 0 : i64, scratch_operands = 0 : i64, tpu.core_type = #tpu.core_type<tc>, window_params = [{pipeline_mode = #tpu.pipeline_mode<synchronous>, transform_indices = @transform_0, window_bounds = array<i64: 1, 128>}, {pipeline_mode = #tpu.pipeline_mode<synchronous>, transform_indices = @transform_1, window_bounds = array<i64: 1, 128>}, {transform_indices = @transform_2, window_bounds = array<i64: 16, 128>}, {transform_indices = @transform_3, window_bounds = array<i64: 16, 128>}]} {
    %c0 = arith.constant 0 : index
    %c0_0 = arith.constant 0 : index
    %0 = vector.load %arg3[%c0, %c0_0] : memref<16x128xf32, #tpu.memory_space<vmem>>, vector<16x128xf32>
    %c0_1 = arith.constant 0 : index
    %c0_2 = arith.constant 0 : index
    %1 = vector.load %arg1[%c0_1, %c0_2] : memref<1x128xf32, #tpu.memory_space<vmem>>, vector<1x128xf32>
    %2 = vector.broadcast %1 : vector<1x128xf32> to vector<16x128xf32>
    %3 = arith.mulf %0, %2 : vector<16x128xf32>
    %c0_3 = arith.constant 0 : index
    %c0_4 = arith.constant 0 : index
    %4 = vector.load %arg2[%c0_3, %c0_4] : memref<1x128xf32, #tpu.memory_space<vmem>>, vector<1x128xf32>
    %5 = vector.broadcast %4 : vector<1x128xf32> to vector<16x128xf32>
    %6 = arith.addf %3, %5 : vector<16x128xf32>
    %c0_5 = arith.constant 0 : index
    %c0_6 = arith.constant 0 : index
    %7 = vector.load %arg4[%c0_5, %c0_6] : memref<16x128xf32, #tpu.memory_space<vmem>>, vector<16x128xf32>
    tpu.vector_store %arg4[%c0_5, %c0_6], %6 {strides = array<i32>} : memref<16x128xf32, #tpu.memory_space<vmem>>, vector<16x128xf32>,
    return
  }
  func.func @transform_0(%arg0: i32) -> (i32, i32) {
    %c0_i32 = arith.constant 0 : i32
    %c0_i32_0 = arith.constant 0 : i32
    %c0_i32_1 = arith.constant 0 : i32
    return %c0_i32, %c0_i32_0 : i32, i32
  }
  func.func @transform_1(%arg0: i32) -> (i32, i32) {
    %c0_i32 = arith.constant 0 : i32
    %c0_i32_0 = arith.constant 0 : i32
    %c0_i32_1 = arith.constant 0 : i32
    return %c0_i32, %c0_i32_0 : i32, i32
  }
  func.func @transform_2(%arg0: i32) -> (i32, i32) {
    %c0_i32 = arith.constant 0 : i32
    %c0_i32_0 = arith.constant 0 : i32
    return %arg0, %c0_i32 : i32, i32
  }
  func.func @transform_3(%arg0: i32) -> (i32, i32) {
    %c0_i32 = arith.constant 0 : i32
    %c0_i32_0 = arith.constant 0 : i32
    return %arg0, %c0_i32 : i32, i32
  }
}

</mosaic_0001>

<bundles_post_ra>
// kernel: spectrogram_norm.2
= control target key start
LH: loop header
LB: loop body
LE: loop exit
PB: predicated region body
PF: predicated region fallthrough
CT: control target
= control target key end

     0   :  { %v49_v0 = vmov 0.0   ;;  %s89_s1 = inlined_call_operand.vmem [shape: f32[1,128], index: 1, kind: output, shape index: {0}]   ;;  %s90_s2 = inlined_call_operand.vmem [shape: f32[1,128], index: 2, kind: output, shape index: {1}]   ;;  %s91_s0 = inlined_call_operand.vmem [shape: f32[16,128], index: 0, kind: input, shape index: {}]  }
   0x1   :  { %14 = vst [vmem:[%s89_s1] sm:$0x1] %v49_v0  ;;  %15 = vst [vmem:[%s90_s2] sm:$0x1] %v49_v0  ;;  %v16_v1 = vld [vmem:[%s91_s0] sm:$0xff]  ;;  %v17_v2 = vld [vmem:[%s91_s0 + $0x8] sm:$0xff] }
   0x2   :  { %v19_v3 = vadd.f32 %v17_v2, %v16_v1  ;;  %v29_v4 = vmul.f32 %v16_v1, %v16_v1  ;;  %v30_v5 = vmul.f32 %v17_v2, %v17_v2 }
   0x4   :  { %v20_v6 = vrot.slane %v19_v3, 4  ;;  %v31_v7 = vadd.f32 %v30_v5, %v29_v4 }
   0x6   :  { %v21_v8 = vadd.f32 %v20_v6, %v19_v3  ;;  %v32_v9 = vrot.slane %v31_v7, 4 }
   0x8   :  { %v22_v10 = vrot.slane %v21_v8, 2  ;;  %v33_v11 = vadd.f32 %v32_v9, %v31_v7  ;;  %v18_v16 = vld [vmem:[%s89_s1] sm:$0x1] }
   0x9   :  { %v28_v19 = vld [vmem:[%s90_s2] sm:$0x1] }
   0xa   :  { %v23_v12 = vadd.f32 %v22_v10, %v21_v8  ;;  %v34_v13 = vrot.slane %v33_v11, 2 }
   0xc   :  { %v24_v14 = vrot.slane %v23_v12, 1  ;;  %v35_v15 = vadd.f32 %v34_v13, %v33_v11 }
   0xe   :  { %v25_v17 = vadd.f32 %v24_v14, %v23_v12  ;;  %v36_v18 = vrot.slane %v35_v15, 1 }
  0x10   :  { %v26_v20 = vadd.f32 %v25_v17, %v18_v16  ;;  %v37_v21 = vadd.f32 %v36_v18, %v35_v15 }
  0x12   :  { %27 = vst [vmem:[%s89_s1] sm:$0x1] %v26_v20  ;;  %v38_v22 = vadd.f32 %v37_v21, %v28_v19 }
  0x14   :  { %39 = vst [vmem:[%s90_s2] sm:$0x1] %v38_v22 }

// kernel: spectrogram_norm.3
= control target key start
LH: loop header
LB: loop body
LE: loop exit
PB: predicated region body
PF: predicated region fallthrough
CT: control target
= control target key end

     0   :  { %s80_s0 = inlined_call_operand.vmem [shape: f32[1,128], index: 0, kind: input, shape index: {}]   ;;  %s81_s1 = inlined_call_operand.vmem [shape: f32[1,128], index: 1, kind: input, shape index: {}]   ;;  %s82_s2 = inlined_call_operand.vmem [shape: f32[16,128], index: 2, kind: input, shape index: {}]   ;;  %s83_s3 = inlined_call_operand.vmem [shape: f32[16,128], index: 3, kind: output, shape index: {}]  }
   0x1   :  { %v14_v0 = vld [vmem:[%s82_s2] sm:$0xff]  ;;  %v15_v4 = vld [vmem:[%s82_s2 + $0x8] sm:$0xff] }
   0x2   :  { %v40_v1 = vld [vmem:[%s80_s0] ss:$0 sm:$0xff] }
   0x3   :  { %v41_v2 = vld [vmem:[%s81_s1] ss:$0 sm:$0xff]  ;;  %v23_v3 = vmul.f32 %v40_v1, %v14_v0  ;;  %v24_v5 = vmul.f32 %v40_v1, %v15_v4 }
   0x5   :  { %v32_v6 = vadd.f32 %v41_v2, %v23_v3  ;;  %v33_v7 = vadd.f32 %v41_v2, %v24_v5 }
   0x7   :  { %34 = vst [vmem:[%s83_s3] sm:$0xff] %v32_v6  ;;  %35 = vst [vmem:[%s83_s3 + $0x8] sm:$0xff] %v33_v7 }

</bundles_post_ra>
